<compile_context>
chip_gen: v5e
topology: v5e:2x2
jax: 0.10.0
libtpu: 0.0.40
codegen_flags: <defaults>
</compile_context>

<pallas_src>
import functools

import jax
import jax.numpy as jnp
from jax.experimental import pallas as pl
from jax.experimental.pallas import tpu as pltpu

_LANE = 128


def _channel_attention_kernel(x_ref, w1t_ref, w2t_ref, o_ref,
                              sum_acc, max_acc, *, hw, tile_hw, rem, c_sub):
    """One (batch-block, spatial-slab) grid step.

    x_ref:   (bt, C, tile_hw)   current spatial slab (last slab may be ragged)
    w1t_ref: (C, Cr)  f32       fc1 weight, pre-transposed (grid-invariant)
    w2t_ref: (Cr, C)  f32       fc2 weight, pre-transposed (grid-invariant)
    o_ref:   (1, bt, C) f32     sigmoid(fc2(relu(fc1(avg)) + relu(fc1(max))))
    sum_acc: (bt, C, lw) f32    running per-lane sum (VMEM scratch)
    max_acc: (bt, C, lw) f32    running per-lane max (VMEM scratch)
    """
    k = pl.program_id(1)
    is_last = k == pl.num_programs(1) - 1
    bt, c, _ = x_ref.shape
    lw = sum_acc.shape[-1]                       # min(128, tile_hw)
    n_chunks = (tile_hw + lw - 1) // lw          # static
    needs_mask = rem < tile_hw                   # static: ragged last slab?

    @pl.when(k == 0)
    def _init():
        sum_acc[...] = jnp.zeros_like(sum_acc)
        max_acc[...] = jnp.full_like(max_acc, -jnp.inf)

    if needs_mask:
        lane = jax.lax.broadcasted_iota(jnp.int32, (1, 1, lw), 2)
        not_last = jnp.logical_not(is_last)

    # Sub-tiled accumulation: small hoisted partials per (batch-row, C-group)
    # bound the live vreg set (~3 * c_sub/8 vregs) regardless of bt and C.
    for b in range(bt):                              # static unroll
        for c0 in range(0, c, c_sub):                # static unroll
            cs = min(c_sub, c - c0)
            s = sum_acc[b:b + 1, c0:c0 + cs, :]
            m = max_acc[b:b + 1, c0:c0 + cs, :]
            for g in range(n_chunks):                # static, lane-aligned
                lo = g * lw
                chunk = x_ref[b:b + 1, c0:c0 + cs, lo:lo + lw].astype(jnp.float32)
                if needs_mask and lo + lw > rem:
                    # Chunk can overlap the ragged tail: mask only when this
                    # really is the final slab (cheap selects, VPU has slack).
                    valid = jnp.logical_or(not_last, lane < max(rem - lo, 0))
                    s = s + jnp.where(valid, chunk, 0.0)
                    m = jnp.maximum(m, jnp.where(valid, chunk, -jnp.inf))
                else:
                    s = s + chunk
                    m = jnp.maximum(m, chunk)
            sum_acc[b:b + 1, c0:c0 + cs, :] = s
            max_acc[b:b + 1, c0:c0 + cs, :] = m

    @pl.when(is_last)
    def _finalize():
        avg = jnp.sum(sum_acc[...], axis=-1) * (1.0 / hw)      # (bt, C)
        mx = jnp.max(max_acc[...], axis=-1)                    # (bt, C)
        w1t = w1t_ref[...]
        h = (jnp.maximum(jnp.dot(avg, w1t, preferred_element_type=jnp.float32), 0.0)
             + jnp.maximum(jnp.dot(mx, w1t, preferred_element_type=jnp.float32), 0.0))
        # fc2 is linear & bias-free: fc2(h_avg) + fc2(h_max) == fc2(h_avg + h_max).
        out = jnp.dot(h, w2t_ref[...], preferred_element_type=jnp.float32)
        o_ref[...] = jax.nn.sigmoid(out)[None].astype(o_ref.dtype)


def _pick_bt(B, C, target_tile_bytes):
    """Largest divisor of B (<= 8) that (a) leaves >= 2 blocks on the
    'parallel' batch axis when possible (v7x megacore) and (b) keeps the
    minimum per-step footprint within the byte budget."""
    divs = sorted([d for d in range(1, min(8, B) + 1) if B % d == 0],
                  reverse=True)

    def fits(d):  # conservative: f32 word size (covers the f32 accumulators)
        return d * C * _LANE * 4 <= target_tile_bytes

    for need_two_blocks in (True, False):
        for d in divs:
            if need_two_blocks and B // d < 2:
                continue
            if fits(d):
                return d
    return 1


def _pick_tile_hw(HW, bt, C, itemsize, target_tile_bytes):
    """Lane-aligned spatial slab width.  Prefers a multiple-of-128 divisor of
    HW (no masking / no ragged tail) unless that would more than halve the
    slab; never exceeds the per-buffer byte budget."""
    if HW < _LANE:
        return HW                                     # single un-tiled slab
    hw_floor = (HW // _LANE) * _LANE
    cap = max(_LANE, (target_tile_bytes // (bt * C * itemsize)) // _LANE * _LANE)
    t_nodiv = min(hw_floor, cap)
    t_div = 0
    t = t_nodiv
    while t >= _LANE:
        if HW % t == 0:
            t_div = t
            break
        t -= _LANE
    return t_div if (t_div and 2 * t_div >= t_nodiv) else t_nodiv


def channel_attention(x, w1, w2, *, target_tile_bytes=4 << 20, c_sub=32):
    """x: (B, C, H, W) float; w1: (C//r, C); w2: (C, C//r).  Returns (B, C, 1, 1) f32."""
    B, C, H, W = x.shape
    Cr = w1.shape[0]
    assert w1.shape == (Cr, C) and w2.shape == (C, Cr)
    HW = H * W
    itemsize = jnp.dtype(x.dtype).itemsize
    c_sub = max(8, (min(c_sub, C) // 8) * 8) if C >= 8 else C

    bt = _pick_bt(B, C, target_tile_bytes)
    n_b = B // bt
    tile_hw = _pick_tile_hw(HW, bt, C, itemsize, target_tile_bytes)
    n_k = pl.cdiv(HW, tile_hw)
    rem = HW - (n_k - 1) * tile_hw                # valid width of the last slab
    lw = min(_LANE, tile_hw)                      # accumulator lane width

    # Rough VMEM footprint (double-buffered slab + accumulators + weights);
    # keep inside every generation's scoped-VMEM budget (v7x has 64 MiB total).
    est_vmem = (2 * bt * C * tile_hw * itemsize + 2 * bt * C * lw * 4
                + 2 * C * Cr * 4)
    assert est_vmem <= 24 * 1024 * 1024, (
        f"estimated VMEM footprint {est_vmem} B too large; "
        f"lower target_tile_bytes (got {target_tile_bytes})")

    x_flat = x.reshape(B, C, HW)                  # metadata-only reshape, no copy

    kernel = functools.partial(_channel_attention_kernel, hw=HW,
                               tile_hw=tile_hw, rem=rem, c_sub=c_sub)

    out = pl.pallas_call(
        kernel,
        out_shape=jax.ShapeDtypeStruct((n_b, bt, C), jnp.float32),
        grid_spec=pltpu.PrefetchScalarGridSpec(
            num_scalar_prefetch=0,
            grid=(n_b, n_k),                                  # reduction axis last
            in_specs=[
                pl.BlockSpec((bt, C, tile_hw), lambda b, k: (b, 0, k)),
                pl.BlockSpec((C, Cr), lambda b, k: (0, 0)),   # grid-invariant
                pl.BlockSpec((Cr, C), lambda b, k: (0, 0)),   # grid-invariant
            ],
            out_specs=pl.BlockSpec((1, bt, C), lambda b, k: (b, 0, 0)),
            scratch_shapes=[
                pltpu.VMEM((bt, C, lw), jnp.float32),         # running sum
                pltpu.VMEM((bt, C, lw), jnp.float32),         # running max
            ],
        ),
        compiler_params=pltpu.CompilerParams(
            dimension_semantics=("parallel", "arbitrary")),
    )(x_flat, w1.T.astype(jnp.float32), w2.T.astype(jnp.float32))

    return out.reshape(B, C, 1, 1)


def channel_attention_ref(x, w1, w2):
    """Pure-JAX reference mirroring the PyTorch forward."""
    avg = jnp.mean(x, axis=(2, 3))
    mx = jnp.max(x, axis=(2, 3))

    def mlp(v):
        return jnp.maximum(v @ w1.T, 0.0) @ w2.T

    return jax.nn.sigmoid(mlp(avg) + mlp(mx))[:, :, None, None]


if __name__ == "__main__":
    key = jax.random.PRNGKey(0)
    k_x, k_w1, k_w2, k_x2, k_x4 = jax.random.split(key, 5)

    # Shared 1x1-conv weights (squeezed to matrices), ratio = 8.
    B, C, H, W, ratio = 2, 32, 16, 16, 8
    Cr = C // ratio
    w1 = jax.random.normal(k_w1, (Cr, C), dtype=jnp.float32) * 0.1
    w2 = jax.random.normal(k_w2, (C, Cr), dtype=jnp.float32) * 0.1

    # Case 1: lane-aligned spatial extent, single HW slab, bt=1 / n_b=2.
    x = jax.random.normal(k_x, (B, C, H, W), dtype=jnp.float32)
    out = jax.block_until_ready(channel_attention(x, w1, w2))
    ref = channel_attention_ref(x, w1, w2)
    assert out.shape == (B, C, 1, 1)
    assert jnp.allclose(out, ref, atol=1e-5, rtol=1e-5)

    # Case 2: ragged spatial extent (13x13), multiple HW slabs, masked tail,
    # multiple batch blocks (bt=8, n_b=2) -> exercises init/mask/finalize.
    B2, H2, W2 = 16, 13, 13
    x2 = jax.random.normal(k_x2, (B2, C, H2, W2), dtype=jnp.float32)
    out2 = jax.block_until_ready(channel_attention(x2, w1, w2))
    ref2 = channel_attention_ref(x2, w1, w2)
    assert out2.shape == (B2, C, 1, 1)
    assert jnp.allclose(out2, ref2, atol=1e-5, rtol=1e-5)

    # Case 3: bf16 activations (half HBM traffic), f32 accumulation in-kernel.
    x3 = x.astype(jnp.bfloat16)
    out3 = jax.block_until_ready(channel_attention(x3, w1, w2))
    ref3 = channel_attention_ref(x3.astype(jnp.float32), w1, w2)
    assert jnp.allclose(out3, ref3, atol=1e-3, rtol=1e-3)

    # Case 4: aligned HW with a small byte budget -> divisor-chosen multi-slab,
    # multi-chunk path (tile_hw=512, n_k=2, no masking).
    x4 = jax.random.normal(k_x4, (B, C, 32, 32), dtype=jnp.float32)
    out4 = jax.block_until_ready(
        channel_attention(x4, w1, w2, target_tile_bytes=64 << 10))
    ref4 = channel_attention_ref(x4, w1, w2)
    assert jnp.allclose(out4, ref4, atol=1e-5, rtol=1e-5)

    print("KERNEL_OK")
</pallas_src>

<mosaic_0001>
module attributes {stable_mosaic.version = 11 : i64} {
  func.func @_channel_attention_kernel(%arg0: i32, %arg1: i32, %arg2: memref<1x32x256xf32, #tpu.memory_space<vmem>>, %arg3: memref<32x4xf32, #tpu.memory_space<vmem>>, %arg4: memref<4x32xf32, #tpu.memory_space<vmem>>, %arg5: memref<1x1x32xf32, #tpu.memory_space<vmem>>, %arg6: memref<1x32x128xf32, #tpu.memory_space<vmem>>, %arg7: memref<1x32x128xf32, #tpu.memory_space<vmem>>) attributes {dimension_semantics = [#tpu.dimension_semantics<parallel>, #tpu.dimension_semantics<arbitrary>], iteration_bounds = array<i64: 2, 1>, scalar_prefetch = 0 : i64, scratch_operands = 2 : i64, tpu.core_type = #tpu.core_type<tc>, window_params = [{transform_indices = @transform_0, window_bounds = array<i64: 1, 32, 256>}, {pipeline_mode = #tpu.pipeline_mode<synchronous>, transform_indices = @transform_1, window_bounds = array<i64: 32, 4>}, {pipeline_mode = #tpu.pipeline_mode<synchronous>, transform_indices = @transform_2, window_bounds = array<i64: 4, 32>}, {transform_indices = @transform_3, window_bounds = array<i64: 1, 1, 32>}]} {
    %c0_i32 = arith.constant 0 : i32
    %0 = arith.cmpi eq, %arg1, %c0_i32 : i32
    %c0_i32_0 = arith.constant 0 : i32
    %1 = arith.cmpi eq, %arg1, %c0_i32_0 : i32
    %2 = arith.extui %1 : i1 to i32
    %c0_i32_1 = arith.constant 0 : i32
    %3 = arith.cmpi ne, %2, %c0_i32_1 : i32
    scf.if %3 {
      %cst = arith.constant 0.000000e+00 : f32
      %16 = vector.broadcast %cst : f32 to vector<1x32x128xf32>
      %c0_19 = arith.constant 0 : index
      %c0_20 = arith.constant 0 : index
      %c0_21 = arith.constant 0 : index
      %17 = vector.load %arg6[%c0_19, %c0_20, %c0_21] : memref<1x32x128xf32, #tpu.memory_space<vmem>>, vector<1x32x128xf32>
      tpu.vector_store %arg6[%c0_19, %c0_20, %c0_21], %16 {strides = array<i32>} : memref<1x32x128xf32, #tpu.memory_space<vmem>>, vector<1x32x128xf32>,
      %cst_22 = arith.constant 0xFF800000 : f32
      %18 = vector.broadcast %cst_22 : f32 to vector<1x32x128xf32>
      %c0_23 = arith.constant 0 : index
      %c0_24 = arith.constant 0 : index
      %c0_25 = arith.constant 0 : index
      %19 = vector.load %arg7[%c0_23, %c0_24, %c0_25] : memref<1x32x128xf32, #tpu.memory_space<vmem>>, vector<1x32x128xf32>
      tpu.vector_store %arg7[%c0_23, %c0_24, %c0_25], %18 {strides = array<i32>} : memref<1x32x128xf32, #tpu.memory_space<vmem>>, vector<1x32x128xf32>,
    } else {
    }
    %c0 = arith.constant 0 : index
    %c0_2 = arith.constant 0 : index
    %c0_3 = arith.constant 0 : index
    %4 = vector.load %arg6[%c0, %c0_2, %c0_3] : memref<1x32x128xf32, #tpu.memory_space<vmem>>, vector<1x32x128xf32>
    %c0_4 = arith.constant 0 : index
    %c0_5 = arith.constant 0 : index
    %c0_6 = arith.constant 0 : index
    %5 = vector.load %arg7[%c0_4, %c0_5, %c0_6] : memref<1x32x128xf32, #tpu.memory_space<vmem>>, vector<1x32x128xf32>
    %c0_7 = arith.constant 0 : index
    %c0_8 = arith.constant 0 : index
    %c0_9 = arith.constant 0 : index
    %6 = vector.load %arg2[%c0_7, %c0_8, %c0_9] : memref<1x32x256xf32, #tpu.memory_space<vmem>>, vector<1x32x128xf32>
    %7 = arith.addf %4, %6 : vector<1x32x128xf32>
    %8 = arith.maximumf %5, %6 : vector<1x32x128xf32>
    %c0_10 = arith.constant 0 : index
    %c0_11 = arith.constant 0 : index
    %c128 = arith.constant 128 : index
    %9 = vector.load %arg2[%c0_10, %c0_11, %c128] : memref<1x32x256xf32, #tpu.memory_space<vmem>>, vector<1x32x128xf32>
    %10 = arith.addf %7, %9 : vector<1x32x128xf32>
    %11 = arith.maximumf %8, %9 : vector<1x32x128xf32>
    %c0_12 = arith.constant 0 : index
    %c0_13 = arith.constant 0 : index
    %c0_14 = arith.constant 0 : index
    %12 = vector.load %arg6[%c0_12, %c0_13, %c0_14] : memref<1x32x128xf32, #tpu.memory_space<vmem>>, vector<1x32x128xf32>
    tpu.vector_store %arg6[%c0_12, %c0_13, %c0_14], %10 {strides = array<i32>} : memref<1x32x128xf32, #tpu.memory_space<vmem>>, vector<1x32x128xf32>,
    %c0_15 = arith.constant 0 : index
    %c0_16 = arith.constant 0 : index
    %c0_17 = arith.constant 0 : index
    %13 = vector.load %arg7[%c0_15, %c0_16, %c0_17] : memref<1x32x128xf32, #tpu.memory_space<vmem>>, vector<1x32x128xf32>
    tpu.vector_store %arg7[%c0_15, %c0_16, %c0_17], %11 {strides = array<i32>} : memref<1x32x128xf32, #tpu.memory_space<vmem>>, vector<1x32x128xf32>,
    %14 = arith.extui %0 : i1 to i32
    %c0_i32_18 = arith.constant 0 : i32
    %15 = arith.cmpi ne, %14, %c0_i32_18 : i32
    scf.if %15 {
      %c0_19 = arith.constant 0 : index
      %c0_20 = arith.constant 0 : index
      %c0_21 = arith.constant 0 : index
      %16 = vector.load %arg6[%c0_19, %c0_20, %c0_21] : memref<1x32x128xf32, #tpu.memory_space<vmem>>, vector<1x32x128xf32>
      %cst = arith.constant dense<0.000000e+00> : vector<1x32xf32>
      %17 = vector.multi_reduction <add>, %16, %cst [2] : vector<1x32x128xf32> to vector<1x32xf32>
      %cst_22 = arith.constant 3.906250e-03 : f32
      %18 = vector.broadcast %cst_22 : f32 to vector<1x32xf32>
      %19 = arith.mulf %17, %18 : vector<1x32xf32>
      %c0_23 = arith.constant 0 : index
      %c0_24 = arith.constant 0 : index
      %c0_25 = arith.constant 0 : index
      %20 = vector.load %arg7[%c0_23, %c0_24, %c0_25] : memref<1x32x128xf32, #tpu.memory_space<vmem>>, vector<1x32x128xf32>
      %cst_26 = arith.constant dense<0xFF800000> : vector<1x32xf32>
      %21 = vector.multi_reduction <maximumf>, %20, %cst_26 [2] : vector<1x32x128xf32> to vector<1x32xf32>
      %c0_27 = arith.constant 0 : index
      %c0_28 = arith.constant 0 : index
      %22 = vector.load %arg3[%c0_27, %c0_28] : memref<32x4xf32, #tpu.memory_space<vmem>>, vector<32x4xf32>
      %cst_29 = arith.constant dense<0.000000e+00> : vector<1x4xf32>
      %23 = tpu.matmul %19, %22, %cst_29 {dimension_numbers = #tpu.dot_dimension_numbers<[1], [0], [0], [1], [0, 0, 1, 1], [], []>} : vector<1x32xf32>, vector<32x4xf32>, vector<1x4xf32> -> vector<1x4xf32>
      %cst_30 = arith.constant 0.000000e+00 : f32
      %24 = vector.broadcast %cst_30 : f32 to vector<1x4xf32>
      %25 = arith.maximumf %23, %24 : vector<1x4xf32>
      %cst_31 = arith.constant dense<0.000000e+00> : vector<1x4xf32>
      %26 = tpu.matmul %21, %22, %cst_31 {dimension_numbers = #tpu.dot_dimension_numbers<[1], [0], [0], [1], [0, 0, 1, 1], [], []>} : vector<1x32xf32>, vector<32x4xf32>, vector<1x4xf32> -> vector<1x4xf32>
      %cst_32 = arith.constant 0.000000e+00 : f32
      %27 = vector.broadcast %cst_32 : f32 to vector<1x4xf32>
      %28 = arith.maximumf %26, %27 : vector<1x4xf32>
      %29 = arith.addf %25, %28 : vector<1x4xf32>
      %c0_33 = arith.constant 0 : index
      %c0_34 = arith.constant 0 : index
      %30 = vector.load %arg4[%c0_33, %c0_34] : memref<4x32xf32, #tpu.memory_space<vmem>>, vector<4x32xf32>
      %cst_35 = arith.constant dense<0.000000e+00> : vector<1x32xf32>
      %31 = tpu.matmul %29, %30, %cst_35 {dimension_numbers = #tpu.dot_dimension_numbers<[1], [0], [0], [1], [0, 0, 1, 1], [], []>} : vector<1x4xf32>, vector<4x32xf32>, vector<1x32xf32> -> vector<1x32xf32>
      %32 = arith.negf %31 : vector<1x32xf32>
      %33 = math.exp %32 : vector<1x32xf32>
      %cst_36 = arith.constant 1.000000e+00 : f32
      %34 = vector.broadcast %cst_36 : f32 to vector<1x32xf32>
      %35 = arith.addf %34, %33 : vector<1x32xf32>
      %36 = arith.divf %34, %35 : vector<1x32xf32>
      %37 = vector.shape_cast %36 : vector<1x32xf32> to vector<1x1x32xf32>
      %c0_37 = arith.constant 0 : index
      %c0_38 = arith.constant 0 : index
      %c0_39 = arith.constant 0 : index
      %38 = vector.load %arg5[%c0_37, %c0_38, %c0_39] : memref<1x1x32xf32, #tpu.memory_space<vmem>>, vector<1x1x32xf32>
      tpu.vector_store %arg5[%c0_37, %c0_38, %c0_39], %37 {strides = array<i32>} : memref<1x1x32xf32, #tpu.memory_space<vmem>>, vector<1x1x32xf32>,
    } else {
    }
    return
  }
  func.func @transform_0(%arg0: i32, %arg1: i32) -> (i32, i32, i32) {
    %c0_i32 = arith.constant 0 : i32
    %c0_i32_0 = arith.constant 0 : i32
    return %arg0, %c0_i32, %arg1 : i32, i32, i32
  }
  func.func @transform_1(%arg0: i32, %arg1: i32) -> (i32, i32) {
    %c0_i32 = arith.constant 0 : i32
    %c0_i32_0 = arith.constant 0 : i32
    %c0_i32_1 = arith.constant 0 : i32
    return %c0_i32, %c0_i32_0 : i32, i32
  }
  func.func @transform_2(%arg0: i32, %arg1: i32) -> (i32, i32) {
    %c0_i32 = arith.constant 0 : i32
    %c0_i32_0 = arith.constant 0 : i32
    %c0_i32_1 = arith.constant 0 : i32
    return %c0_i32, %c0_i32_0 : i32, i32
  }
  func.func @transform_3(%arg0: i32, %arg1: i32) -> (i32, i32, i32) {
    %c0_i32 = arith.constant 0 : i32
    %c0_i32_0 = arith.constant 0 : i32
    %c0_i32_1 = arith.constant 0 : i32
    return %arg0, %c0_i32, %c0_i32_0 : i32, i32, i32
  }
}

</mosaic_0001>

<bundles_post_ra>
// kernel: tpu_custom_call.1
= control target key start
LH: loop header
LB: loop body
LE: loop exit
PB: predicated region body
PF: predicated region fallthrough
CT: control target
= control target key end

     0   :  { %8 = vsyncpa [#allocation5], 0  ;;  %s871_s0 = inlined_call_operand.hbm [shape: f32[2,32,256], index: 0, kind: input, shape index: {}]   ;;  %s872_s1 = inlined_call_operand.vmem [shape: f32[32,4], index: 1, kind: input, shape index: {}]   ;;  %s873_s2 = inlined_call_operand.vmem [shape: f32[4,32], index: 2, kind: input, shape index: {}]   ;;  %s874_s3 = inlined_call_operand.hbm [shape: f32[2,1,32], index: 3, kind: output, shape index: {}]  }
   0x1   :  { %10 = vsyncpa [#allocation5 + $0x1], 0 }
   0x2   :  { %11 = vsyncpa [#allocation6], 0 }
   0x3   :  { %13 = vsyncpa [#allocation6 + $0x1], 0  ;;  %s733_s12 = smov 0   ;;  %s735_s13 = smov 0  }
   0x4   :  { %s737_s14 = smov 0   ;;  %s739_s15 = smov 0  }
   0x5   :  { %s741_s16 = smov 0   ;;  %s743_s17 = smov 0  }
   0x6 LB: > { %s512_s18 = sadd.s32 4294967295, %s709_s17   ;;  %s513_s19 = sadd.s32 4294967294, %s709_s17   ;;  %s709_s17 = sphi %s743_s17, %s19_s17   ;;  %s705_s16 = sphi %s741_s16, %s883_s16   ;;  %s701_s15 = sphi %s739_s15, %s882_s15   ;;  %s697_s14 = sphi %s737_s14, %s881_s14   ;;  %s693_s13 = sphi %s735_s13, %s880_s13   ;;  %s689_s12 = sphi %s733_s12, %s879_s12  }
   0x7   : > { %s31_s20 = sadd.s32 1, %s705_s16  ;;  %s40_s21 = sadd.s32 1, %s697_s14 }
   0x8   : > { %p33_p0 = scmp.ge.s32.totalorder %s31_s20, 2  ;;  %p47_p1 = scmp.ne.s32.totalorder %s697_s14, %s693_s13 }
   0x9   : > { %p48_p2 = scmp.eq.s32.totalorder %s709_s17, 0  ;;  %p53_p3 = scmp.ne.s32.totalorder %s693_s13, %s689_s12 }
   0xa   : > { %s885_s20 = smov (%p33_p0, %s31_s20), 0  ;;  %p54_p5 = scmp.eq.s32.totalorder %s512_s18, 0 }
   0xb   : > { %p774_p4 = por %p48_p2, %p47_p1  ;;  %s35_s23 = ssub.s32 %s705_s16, %s885_s20 }
   0xc   : > { %p119_p6 = scmp.eq.s32.totalorder %s512_s18, 1  ;;  %p38_p7 = scmp.eq.s32.totalorder %s35_s23, 0 }
   0xd   : > { %p780_p8 = por %p54_p5, %p53_p3  ;;  %p125_p10 = scmp.eq.s32.totalorder %s513_s19, 1 }
   0xe   : > { %p784_p9 = por %p119_p6, %p47_p1  ;;  %p515_p12 = scmp.ge.s32.totalorder %s709_s17, 2 }
   0xf   : > { %s789_s26 = scalar_select %p38_p7, %s697_s14, %s40_s21  }
  0x10   : > { %p791_p11 = por %p125_p10, %p53_p3  ;;  %p541_p13 = scmp.lt.s32.totalorder %s709_s17, 2 }
  0x11   : > { %s151_s28 = sand.u32 1, %s697_s14   ;;  %s528_s30 = sshll.u32 %s705_s16, 6 }
  0x12   : > { %s516_s29 = sshll.u32 %s151_s28, 6  ;;  %s162_s6 = scalar_lea.hbm %s871_s0, %s528_s30 }
  0x13   : > { %s155_s7 = scalar_lea.vmem [#allocation4], %s516_s29  ;;  %s163_s9 = sshll.u32 %s162_s6, 4  ;;  %s164_s9 = int_to_ptr.hbm [resolvable:$true] %s163_s9 }
  0x14   : > { %s165_s8 = sshll.u32 %s155_s7, 4  ;;  %p534_p0 = pnand %p541_p13, %p774_p4  ;;  %s166_s8 = int_to_ptr.vmem [resolvable:$true] %s165_s8 }
  0x15   : > { %p519_p1 = scmp.ge.s32.totalorder %s709_s17, 1  ;;  %s152_s10 = scalar_lea.sflag [#allocation5], %s151_s28 }
  0x16   : > { %s711_s11 = smov 256   ;;  %s712_s18 = smov 16  }
  0x17   : > { %536 = dma.hbm_to_vmem [thread:$0]  (!%p534_p0), %s164_s9, 1024, %s166_s8, %s152_s10, %s711_s11, %s711_s11, %s712_s18  }
  0x18   : > { %p173_p2 = scmp.lt.s32.totalorder %s709_s17, 3 }
  0x1a   : > { %p174_p3 = pnand %p519_p1, %p173_p2 }
  0x1b   : > { %s807_s19 = sand.u32 (!%p174_p3), 1, %s693_s13  }
  0x1c   : > { %177 = sbr.rel (%p174_p3) target bundleno = 466 (0x1d2), region = 32  ;;  %s520_s21 = sshll.u32 (!%p174_p3), %s807_s19, 6 }
  0x1d   : > { %s180_s23 = scalar_lea.sflag (!%p174_p3), [#allocation5], %s807_s19  ;;  %s183_s29 = scalar_lea.vmem (!%p174_p3), [#allocation4], %s520_s21 }
  0x21   : > { %680 = dma.done.wait (%p780_p8), %s180_s23, 1024  }
  0x22   : > { %682 = vsyncadd (%p780_p8), %s180_s23, 4294966272  ;;  %v227_v0 = vld [vmem:[%s183_s29] sm:$0xff]  ;;  %v239_v1 = vld [vmem:[%s183_s29 + $0x8] sm:$0xff]  ;;  %v298_v20 = vlaneseq  ;;  %vm307_vm0 = vcmask 195712   ;;  %vm303_vm1 = vcmask 130112   ;;  %vm311_vm2 = vcmask 261312   ;;  %s431_s18 = scalar_lea.hbm %s874_s3, %s701_s15 }
  0x23   : > { %v229_v2 = vld [vmem:[%s183_s29 + $0x20] sm:$0xff]  ;;  %v247_v3 = vmax.f32 %v227_v0, %v239_v1  ;;  %v243_v4 = vadd.f32 %v239_v1, %v227_v0  ;;  %v241_v5 = vld [vmem:[%s183_s29 + $0x28] sm:$0xff]  ;;  %v228_v7 = vld [vmem:[%s183_s29 + $0x10] sm:$0xff]  ;;  %vm313_vm3 = vcmask 261120   ;;  %vm377_vm4 = vcmask 1043456   ;;  %s205_s21 = scalar_lea.vmem [#allocation7], %s807_s19 }
  0x24   : > { %v245_v6 = vadd.f32 %v241_v5, %v229_v2  ;;  %v240_v8 = vld [vmem:[%s183_s29 + $0x18] sm:$0xff]  ;;  %v230_v9 = vld [vmem:[%s183_s29 + $0x30] sm:$0xff]  ;;  %v249_v14 = vmax.f32 %v229_v2, %v241_v5  ;;  %v291_v18 = vld [vmem:[%s872_s1 + $0x8] sm:$0xff]  ;;  %v299_v24 = vand.u32 127, %v298_v20  ;;  %vm373_vm5 = vcmask 31744   ;;  %s433_s23 = sshll.u32 %s205_s21, 4  ;;  %s434_s23 = int_to_ptr.vmem [resolvable:$true] %s433_s23 }
  0x25   : > { %282 = vmax.xlane.f32.xlu2 %v247_v3  ;;  %266 = vadd.xlane.f32.xlu0 %v243_v4  ;;  %v242_v10 = vld [vmem:[%s183_s29 + $0x38] sm:$0xff]  ;;  %v248_v11 = vmax.f32 %v228_v7, %v240_v8  ;;  %v244_v12 = vadd.f32 %v240_v8, %v228_v7  ;;  %v292_v17 = vld [vmem:[%s872_s1 + $0x10] sm:$0xff]  ;;  %v290_v19 = vld [vmem:[%s872_s1] sm:$0xff]  ;;  %s435_s29 = sshll.u32 %s431_s18, 4  ;;  %vm420_vm9 = vcmask 253952   ;;  %s423_s15 = scalar_lea.sflag [#allocation6], %s807_s19  ;;  %s436_s29 = int_to_ptr.hbm [resolvable:$true] %s435_s29 }
  0x26   : > { %270 = vadd.xlane.f32.xlu1 %v245_v6  ;;  %v246_v13 = vadd.f32 %v242_v10, %v230_v9  ;;  %v250_v15 = vmax.f32 %v230_v9, %v242_v10  ;;  %v293_v16 = vld [vmem:[%s872_s1 + $0x18] sm:$0xff]  ;;  %v305_v26 = vadd.s32 4294967280, %v299_v24  ;;  %v309_v29 = vadd.s32 4294967272, %v299_v24  ;;  %v372_v51 = vld [vmem:[%s873_s2] sm:$0xf]  ;;  %s641_s22 = sshra.s32 %s436_s29, 4  ;;  %s642_s22 = int_to_ptr.hbm [resolvable:$true] %s641_s22 }
  0x27   : > { %328 = vmatpush.msra.mxu0 %v293_v16  ;;  %362 = vmatpush.msra.mxu1 %v293_v16  ;;  %v301_v30 = vadd.s32 4294967288, %v299_v24  ;;  %s643_s24 = scalar_lea.hbm %s642_s22, 1  ;;  %s647_s4 = scalar_lea.hbm %s874_s3, 2 }
  0x28   : > { %523 = vmatpush.msk.msra.mxu2 %vm377_vm4, %v372_v51  ;;  %p644_p4 = scmp.ne.s32.totalorder %s642_s22, %s643_s24  ;;  %p648_p7 = scmp.lt.s32.totalorder %s642_s22, %s874_s3 }
  0x29   : > { %329 = vmatpush.msra.mxu0 %v292_v17  ;;  %363 = vmatpush.msra.mxu1 %v292_v17  ;;  %p649_p8 = scmp.lt.s32.totalorder %s647_s4, %s643_s24 }
  0x2a   : > { %p645_p5 = pnand %p644_p4, %p784_p9 }
  0x2b   : > { %330 = vmatpush.msra.mxu0 %v291_v18  ;;  %364 = vmatpush.msra.mxu1 %v291_v18  ;;  %p650_p10 = por %p649_p8, %p648_p7 }
  0x2c   : > { %p646_p6 = pneg %p645_p5 }
  0x2d   : > { %284 = vmax.xlane.f32.xlu2 %v248_v11  ;;  %268 = vadd.xlane.f32.xlu0 %v244_v12 }
  0x2e   : > { %272 = vadd.xlane.f32.xlu1 %v246_v13  ;;  %331 = vmatpush.msra.mxu0 %v290_v19  ;;  %p651_p13 = pnand %p650_p10, %p646_p6 }
  0x2f   : > { %365 = vmatpush.msra.mxu1 %v290_v19 }
  0x35   : > { %286 = vmax.xlane.f32.xlu0 %v249_v14 }
  0x36   : > { %288 = vmax.xlane.f32.xlu1 %v250_v15 }
  0x98   : > { %v267_v21 = vpop.xlane.xlu0 %266  ;;  %v283_v22 = vpop.xlane.xlu2 %282 }
  0x99   : > { %v271_v23 = vpop.xlane.xlu1 %270  ;;  %v274_v25 = vmul.f32 0.00390625, %v267_v21  ;;  %v341_v40 = vperm.slane %v283_v22, %v299_v24 }
  0x9a   : > { %v276_v27 = vmul.f32 0.00390625, %v271_v23 }
  0x9b   : > { %v300_v34 = vperm.slane %v274_v25, %v299_v24 }
  0x9c   : > { %v306_v37 = vperm.slane %v276_v27, %v305_v26 }
  0xa0   : > { %v269_v28 = vpop.xlane.xlu0 %268  ;;  %v285_v35 = vpop.xlane.xlu2 %284 }
  0xa1   : > { %v275_v31 = vmul.f32 0.00390625, %v269_v28  ;;  %v273_v32 = vpop.xlane.xlu1 %272  ;;  %v342_v41 = vperm.slane %v285_v35, %v301_v30 }
  0xa2   : > { %v277_v33 = vmul.f32 0.00390625, %v273_v32 }
  0xa3   : > { %v302_v36 = vperm.slane %v275_v31, %v301_v30  ;;  %v343_v47 = vsel %vm303_vm1, %v342_v41, %v341_v40 }
  0xa4   : > { %v310_v38 = vperm.slane %v277_v33, %v309_v29 }
  0xa5   : > { %v304_v39 = vsel %vm303_vm1, %v302_v36, %v300_v34 }
  0xa6   : > { %v308_v42 = vsel %vm307_vm0, %v306_v37, %v304_v39 }
  0xa7   : > { %v312_v43 = vsel %vm311_vm2, %v310_v38, %v308_v42 }
  0xa8   : > { %521 = vmatmul.msk.f32.vlgmr.msra.gmra.mxu0 %vm313_vm3, %v312_v43  ;;  %v287_v44 = vpop.xlane.xlu0 %286 }
  0xa9   : > { %v344_v45 = vperm.slane %v287_v44, %v305_v26  ;;  %v289_v46 = vpop.xlane.xlu1 %288 }
  0xaa   : > { %v346_v48 = vperm.slane %v289_v46, %v309_v29 }
  0xab   : > { %v345_v49 = vsel %vm307_vm0, %v344_v45, %v343_v47 }
  0xac   : > { %v347_v50 = vsel %vm311_vm2, %v346_v48, %v345_v49 }
  0xad   : > { %522 = vmatmul.msk.f32.vlgmr.msra.gmra.mxu1 %vm313_vm3, %v347_v50 }
 0x125   : > { %v333_v52 = vpop.f32.mrf.mxu0 }
 0x126   : > { %v336_v54 = vmax.f32 %v333_v52, 0.0 }
 0x12a   : > { %v367_v53 = vpop.f32.mrf.mxu1 }
 0x12b   : > { %v370_v55 = vmax.f32 %v367_v53, 0.0 }
 0x12d   : > { %v371_v56 = vadd.f32 %v370_v55, %v336_v54 }
 0x12f   : > { %524 = vmatmul.msk.f32.vlgmr.msra.gmra.mxu2 %vm373_vm5, %v371_v56 }
 0x1b2   : > { %v398_v57 = vpop.f32.mrf.mxu2 }
 0x1b3   : > { %v525_v58 = vmul.f32 -1.442695, %v398_v57 }
 0x1b5   : > { %593 = vpow2.f32 %v525_v58 }
 0x1bb   : > { %v594_v59 = vpop.eup %593 }
 0x1bc   : > { %v404_v60 = vadd.f32 1.0, %v594_v59 }
 0x1be   : > { %595 = vrcp.f32 %v404_v60  ;;  %v416_v0 = vand.u32 2147483648, %v404_v60  ;;  %v414_v2 = vand.u32 2147483647, %v404_v60  ;;  %vm410_vm7 = vweird.f32 %v404_v60 }
 0x1c0   : > { %v417_v4 = vor.u32 1.1754944e-38, %v416_v0  ;;  %vm415_vm10 = vcmp.eq.f32.partialorder %v414_v2, 8.507059e+37 }
 0x1c4   : > { %v596_v61 = vpop.eup %595 }
 0x1c5   : > { %v406_v62 = vmul.f32 %v596_v61, %v404_v60  ;;  %vm411_vm6 = vweird.f32 %v596_v61 }
 0x1c6   : > { %vm412_vm8 = vmor %vm410_vm7, %vm411_vm6 }
 0x1c7   : > { %v407_v63 = vsub.f32 1.0, %v406_v62 }
 0x1c9   : > { %v408_v1 = vmul.f32 %v596_v61, %v407_v63 }
 0x1cb   : > { %v409_v3 = vadd.f32 %v596_v61, %v408_v1 }
 0x1cd   : > { %v413_v5 = vsel %vm412_vm8, %v596_v61, %v409_v3 }
 0x1ce   : > { %v418_v6 = vsel %vm415_vm10, %v417_v4, %v413_v5 }
 0x1cf   : > { %421 = vst.msk [vmem:[%s205_s21] sm:$0x1] %vm420_vm9, %v418_v6 }
 0x1d0   : > { %654 = shalt.err (!%p651_p13)
}
 0x1d1   : > { %531 = dma.vmem_to_hbm [thread:$0]  (%p784_p9), %s434_s23, 16, %s436_s29, %s423_s15  }
 0x1d2 PF: > { %s447_s19 = sand.u32 1, %s689_s12   ;;  %p538_p0 = pnand %p515_p12, %p791_p11 }
 0x1d3   : > { %s448_s7 = scalar_lea.sflag [#allocation6], %s447_s19 }
 0x1d4   : > { %p539_p1 = pneg %p538_p0 }
 0x1d6   : > { %684 = dma.done.wait (%p539_p1), %s448_s7, 16  }
 0x1d7   : > { %686 = vsyncadd (%p539_p1), %s448_s7, 4294967280  ;;  %s19_s17 = sadd.s32 1, %s709_s17   ;;  %s879_s12 = smov %s693_s13 }
 0x1d8   : > { %p16_p2 = scmp.ge.s32.totalorder %s19_s17, 4   ;;  %s880_s13 = smov %s697_s14 }
 0x1d9   : > { %s881_s14 = smov %s789_s26  ;;  %s882_s15 = smov %s705_s16 }
 0x1da   : > { %s883_s16 = smov %s885_s20  ;;  %18 = sbr.rel (!%p16_p2) target bundleno = 6 (0x6), region = 85 }
 0x1df   :  { %453 = vsyncpa [#allocation5], 1 }
 0x1e0   :  { %455 = vsyncpa [#allocation5 + $0x1], 1 }
 0x1e1   :  { %456 = vsyncpa [#allocation6], 1 }
 0x1e2   :  { %458 = vsyncpa [#allocation6 + $0x1], 1 }

</bundles_post_ra>
